<compile_context>
chip_gen: v6e
topology: v6e:2x2x1
jax: 0.10.0
libtpu: 0.0.40
codegen_flags: <defaults>
</compile_context>

<pallas_src>
import functools

import jax
import jax.numpy as jnp
from jax.experimental import pallas as pl
from jax.experimental.pallas import tpu as pltpu


# ---------------------------------------------------------------------------
# Kernel
# ---------------------------------------------------------------------------
def decoder_kernel(x_ref, w1_ref, b1_ref, w2_ref, b2_ref, whl_ref, bhl_ref, out_ref,
                   *, act_dtype, lane_dense):
    """One batch tile per grid step; weights stay VMEM-resident (constant index maps)."""
    # In-kernel cast (free VPU slot) instead of a wrapper-side astype that would add a
    # full extra HBM read+write pass over x.
    x = x_ref[...].astype(w1_ref.dtype)                        # bf16 (tb, input_dim)

    # MXU accumulate + bias add in f32; tanh in act_dtype (bf16 on v6e/v7x, f32 on v5e).
    a1 = jnp.dot(x, w1_ref[...], preferred_element_type=jnp.float32) + b1_ref[...]
    h1 = jnp.tanh(a1.astype(act_dtype))                        # (tb, 256)

    a2 = jnp.dot(h1.astype(w2_ref.dtype), w2_ref[...],
                 preferred_element_type=jnp.float32) + b2_ref[...]
    h2 = jnp.tanh(a2.astype(act_dtype))                        # (tb, 2*seq_len)

    # Fused, column-interleaved heads: out[:, 2j] = Hx[:, j], out[:, 2j+1] = Lx[:, j].
    out = jnp.dot(h2.astype(whl_ref.dtype), whl_ref[...],
                  preferred_element_type=jnp.float32) + bhl_ref[...]   # f32 (tb, 16)

    if lane_dense:
        # Fold 8 batch rows into one 128-wide lane row: stores become full-lane vst
        # and the output VMEM buffer / writeback DMA are lane-dense. Row-major flat
        # order is preserved, so the wrapper reshape to (B, seq_len, 2) stays free.
        tb, two_seq = out.shape
        out = out.reshape(tb // 8, 8 * two_seq)
    out_ref[...] = out


# ---------------------------------------------------------------------------
# Helpers
# ---------------------------------------------------------------------------
@functools.lru_cache(maxsize=None)
def _lane_fold_reshape_supported():
    """Feature-detect (and validate) the in-register (N,16)->(N//8,128) fold."""
    def probe(x_ref, o_ref):
        o_ref[...] = x_ref[...].reshape(o_ref.shape)
    try:
        x = jnp.arange(256 * 16, dtype=jnp.float32).reshape(256, 16)
        got = pl.pallas_call(
            probe, out_shape=jax.ShapeDtypeStruct((32, 128), jnp.float32))(x)
        return bool(jnp.array_equal(got, x.reshape(32, 128)))
    except Exception:
        return False


def _round_up(v, m):
    return (v + m - 1) // m * m


def _choose_batch_tile(B, block_b):
    """Static batch-tile choice: big tiles, even #steps >= 2 for large B (v7x)."""
    if B <= min(block_b, 1024):
        return B                                  # single full-batch tile
    n_steps = pl.cdiv(B, block_b)
    if n_steps % 2 == 1:
        n_steps += 1                              # even step count keeps both v7x TCs busy
    tile = min(block_b, _round_up(pl.cdiv(B, n_steps), 64))
    return max(8, (tile // 8) * 8)


def prepare_decoder_params(params, compute_dtype=jnp.bfloat16):
    """Fuse the H/L heads (interleaved columns) and cast matmul weights to bf16 once."""
    w1, b1, w2, b2, wh, bh, wl, bl = params
    two_seq, seq_len = wh.shape
    whl = jnp.stack([wh, wl], axis=2).reshape(two_seq, 2 * seq_len)
    bhl = jnp.stack([bh, bl], axis=2).reshape(1, 2 * seq_len)
    return (
        w1.astype(compute_dtype), b1.astype(jnp.float32),
        w2.astype(compute_dtype), b2.astype(jnp.float32),
        whl.astype(compute_dtype), bhl.astype(jnp.float32),
    )


# ---------------------------------------------------------------------------
# Forward
# ---------------------------------------------------------------------------
@functools.partial(jax.jit, static_argnames=("tb", "lane_dense", "act_dtype"))
def _decoder_forward_jit(x, prepared, *, tb, lane_dense, act_dtype):
    w1, b1, w2, b2, whl, bhl = prepared
    B, input_dim = x.shape
    hidden = w1.shape[1]
    two_seq = whl.shape[1]
    seq_len = two_seq // 2
    grid = (pl.cdiv(B, tb),)

    if lane_dense:
        out_shape = jax.ShapeDtypeStruct((B // 8, 8 * two_seq), jnp.float32)
        out_spec = pl.BlockSpec((tb // 8, 8 * two_seq), lambda i: (i, 0))
    else:
        out_shape = jax.ShapeDtypeStruct((B, two_seq), jnp.float32)
        out_spec = pl.BlockSpec((tb, two_seq), lambda i: (i, 0))

    def resident(arr):
        # Constant block index -> loaded once, stays VMEM-resident across grid steps.
        return pl.BlockSpec(arr.shape, lambda i: (0, 0))

    cost = pl.CostEstimate(
        flops=2 * B * (input_dim * hidden + hidden * two_seq + two_seq * two_seq),
        transcendentals=B * (hidden + two_seq),
        bytes_accessed=(B * input_dim * 4 + B * two_seq * 4
                        + (w1.size + w2.size + whl.size) * 2
                        + (b1.size + b2.size + bhl.size) * 4),
    )

    kernel = functools.partial(decoder_kernel, act_dtype=act_dtype, lane_dense=lane_dense)
    out_flat = pl.pallas_call(
        kernel,
        out_shape=out_shape,
        grid=grid,
        in_specs=[
            pl.BlockSpec((tb, input_dim), lambda i: (i, 0)),   # x streamed per tile (f32)
            resident(w1), resident(b1),
            resident(w2), resident(b2),
            resident(whl), resident(bhl),
        ],
        out_specs=out_spec,
        compiler_params=pltpu.CompilerParams(
            dimension_semantics=("parallel",),       # shard batch tiles across v7x TCs
            vmem_limit_bytes=32 * 1024 * 1024,       # covers v5e's 16 MiB default scope
        ),
        cost_estimate=cost,
    )(x, w1, b1, w2, b2, whl, bhl)

    # Interleaved [H0, L0, H1, L1, ...] -> (B, seq_len, 2); pure metadata reshape.
    return out_flat.reshape(B, seq_len, 2)


def decoder_forward(x, prepared, block_b=4096, act_dtype=jnp.bfloat16):
    """x: (B, input_dim) float32 -> (B, seq_len, 2) float32.

    act_dtype: jnp.bfloat16 on v6e/v7x (bf16 EUP); pass jnp.float32 on v5e.
    """
    B = x.shape[0]
    two_seq = prepared[4].shape[1]
    tb = _choose_batch_tile(B, block_b)
    lane_dense = (
        (8 * two_seq) % 128 == 0
        and B % 8 == 0
        and (tb == B or tb % 64 == 0)
        and tb % 8 == 0
        and _lane_fold_reshape_supported()
    )
    return _decoder_forward_jit(x, prepared, tb=tb, lane_dense=lane_dense,
                                act_dtype=act_dtype)


# ---------------------------------------------------------------------------
# Reference + demo
# ---------------------------------------------------------------------------
def init_params(key, seq_len, input_dim):
    """Synthetic params matching nn.Linear shapes, pre-transposed to (in, out)."""
    dims = [
        (input_dim, 2 ** 8),        # linear1
        (2 ** 8, 2 * seq_len),      # linear2
        (2 * seq_len, seq_len),     # linearH
        (2 * seq_len, seq_len),     # linearL
    ]
    params = []
    for fan_in, fan_out in dims:
        key, kw, kb = jax.random.split(key, 3)
        bound = 1.0 / jnp.sqrt(fan_in)
        w = jax.random.uniform(kw, (fan_in, fan_out), jnp.float32, -bound, bound)
        b = jax.random.uniform(kb, (1, fan_out), jnp.float32, -bound, bound)
        params += [w, b]
    return tuple(params)


def reference_forward(x, params):
    w1, b1, w2, b2, wh, bh, wl, bl = params
    h1 = jnp.tanh(x @ w1 + b1)
    h2 = jnp.tanh(h1 @ w2 + b2)
    return jnp.stack([h2 @ wh + bh, h2 @ wl + bl], axis=2)


if __name__ == "__main__":
    # TODO(synk): the module's nn.LSTM submodules (rnn1_0, rnn1_1, rnn1) are never used
    # in forward(), so they are intentionally not translated.
    seq_len, input_dim = 8, 64   # module defaults: hidden_dim = input_dim = 64

    key = jax.random.PRNGKey(0)
    key, kx = jax.random.split(key)
    params = init_params(key, seq_len, input_dim)
    prepared = prepare_decoder_params(params)

    # Small shape consistent with the module (batch=2): single-tile, lane-sparse path.
    batch = 2
    x = jax.random.normal(kx, (batch, input_dim), jnp.float32)
    out = jax.block_until_ready(decoder_forward(x, prepared))
    ref = reference_forward(x, params)
    assert out.shape == (batch, seq_len, 2), out.shape
    # bf16 matmul operands + bf16 activations -> loosened tolerance vs f32 reference.
    assert jnp.allclose(out, ref, atol=5e-2, rtol=5e-2), "mismatch (small batch)"

    # Larger batch: 2 pipelined grid steps of 2048 rows, lane-dense output if supported.
    big_batch = 4096
    key, kx2 = jax.random.split(key)
    xb = jax.random.normal(kx2, (big_batch, input_dim), jnp.float32)
    outb = jax.block_until_ready(decoder_forward(xb, prepared))
    refb = reference_forward(xb, params)
    assert outb.shape == (big_batch, seq_len, 2), outb.shape
    assert jnp.allclose(outb, refb, atol=5e-2, rtol=5e-2), "mismatch (large batch)"

    print("KERNEL_OK")
</pallas_src>

<mosaic_0001>
module attributes {stable_mosaic.version = 11 : i64} {
  func.func @decoder_kernel(%arg0: i32, %arg1: memref<2x64xf32, #tpu.memory_space<vmem>>, %arg2: memref<64x256xbf16, #tpu.memory_space<vmem>>, %arg3: memref<1x256xf32, #tpu.memory_space<vmem>>, %arg4: memref<256x16xbf16, #tpu.memory_space<vmem>>, %arg5: memref<1x16xf32, #tpu.memory_space<vmem>>, %arg6: memref<16x16xbf16, #tpu.memory_space<vmem>>, %arg7: memref<1x16xf32, #tpu.memory_space<vmem>>, %arg8: memref<2x16xf32, #tpu.memory_space<vmem>>) attributes {dimension_semantics = [#tpu.dimension_semantics<parallel>], iteration_bounds = array<i64: 1>, scalar_prefetch = 0 : i64, scratch_operands = 0 : i64, tpu.core_type = #tpu.core_type<tc>, window_params = [{transform_indices = @transform_0, window_bounds = array<i64: 2, 64>}, {pipeline_mode = #tpu.pipeline_mode<synchronous>, transform_indices = @transform_1, window_bounds = array<i64: 64, 256>}, {pipeline_mode = #tpu.pipeline_mode<synchronous>, transform_indices = @transform_2, window_bounds = array<i64: 1, 256>}, {pipeline_mode = #tpu.pipeline_mode<synchronous>, transform_indices = @transform_3, window_bounds = array<i64: 256, 16>}, {pipeline_mode = #tpu.pipeline_mode<synchronous>, transform_indices = @transform_4, window_bounds = array<i64: 1, 16>}, {pipeline_mode = #tpu.pipeline_mode<synchronous>, transform_indices = @transform_5, window_bounds = array<i64: 16, 16>}, {pipeline_mode = #tpu.pipeline_mode<synchronous>, transform_indices = @transform_6, window_bounds = array<i64: 1, 16>}, {transform_indices = @transform_7, window_bounds = array<i64: 2, 16>}]} {
    %c0 = arith.constant 0 : index
    %c0_0 = arith.constant 0 : index
    %0 = vector.load %arg1[%c0, %c0_0] : memref<2x64xf32, #tpu.memory_space<vmem>>, vector<2x64xf32>
    %1 = arith.truncf %0 : vector<2x64xf32> to vector<2x64xbf16>
    %c0_1 = arith.constant 0 : index
    %c0_2 = arith.constant 0 : index
    %2 = vector.load %arg2[%c0_1, %c0_2] : memref<64x256xbf16, #tpu.memory_space<vmem>>, vector<64x256xbf16>
    %cst = arith.constant dense<0.000000e+00> : vector<2x256xf32>
    %3 = tpu.matmul %1, %2, %cst {dimension_numbers = #tpu.dot_dimension_numbers<[1], [0], [0], [1], [0, 0, 1, 1], [], []>} : vector<2x64xbf16>, vector<64x256xbf16>, vector<2x256xf32> -> vector<2x256xf32>
    %c0_3 = arith.constant 0 : index
    %c0_4 = arith.constant 0 : index
    %4 = vector.load %arg3[%c0_3, %c0_4] : memref<1x256xf32, #tpu.memory_space<vmem>>, vector<1x256xf32>
    %5 = vector.broadcast %4 : vector<1x256xf32> to vector<2x256xf32>
    %6 = arith.addf %3, %5 : vector<2x256xf32>
    %7 = arith.truncf %6 : vector<2x256xf32> to vector<2x256xbf16>
    %8 = math.tanh %7 : vector<2x256xbf16>
    %c0_5 = arith.constant 0 : index
    %c0_6 = arith.constant 0 : index
    %9 = vector.load %arg4[%c0_5, %c0_6] : memref<256x16xbf16, #tpu.memory_space<vmem>>, vector<256x16xbf16>
    %cst_7 = arith.constant dense<0.000000e+00> : vector<2x16xf32>
    %10 = tpu.matmul %8, %9, %cst_7 {dimension_numbers = #tpu.dot_dimension_numbers<[1], [0], [0], [1], [0, 0, 1, 1], [], []>} : vector<2x256xbf16>, vector<256x16xbf16>, vector<2x16xf32> -> vector<2x16xf32>
    %c0_8 = arith.constant 0 : index
    %c0_9 = arith.constant 0 : index
    %11 = vector.load %arg5[%c0_8, %c0_9] : memref<1x16xf32, #tpu.memory_space<vmem>>, vector<1x16xf32>
    %12 = vector.broadcast %11 : vector<1x16xf32> to vector<2x16xf32>
    %13 = arith.addf %10, %12 : vector<2x16xf32>
    %14 = arith.truncf %13 : vector<2x16xf32> to vector<2x16xbf16>
    %15 = math.tanh %14 : vector<2x16xbf16>
    %c0_10 = arith.constant 0 : index
    %c0_11 = arith.constant 0 : index
    %16 = vector.load %arg6[%c0_10, %c0_11] : memref<16x16xbf16, #tpu.memory_space<vmem>>, vector<16x16xbf16>
    %cst_12 = arith.constant dense<0.000000e+00> : vector<2x16xf32>
    %17 = tpu.matmul %15, %16, %cst_12 {dimension_numbers = #tpu.dot_dimension_numbers<[1], [0], [0], [1], [0, 0, 1, 1], [], []>} : vector<2x16xbf16>, vector<16x16xbf16>, vector<2x16xf32> -> vector<2x16xf32>
    %c0_13 = arith.constant 0 : index
    %c0_14 = arith.constant 0 : index
    %18 = vector.load %arg7[%c0_13, %c0_14] : memref<1x16xf32, #tpu.memory_space<vmem>>, vector<1x16xf32>
    %19 = vector.broadcast %18 : vector<1x16xf32> to vector<2x16xf32>
    %20 = arith.addf %17, %19 : vector<2x16xf32>
    %c0_15 = arith.constant 0 : index
    %c0_16 = arith.constant 0 : index
    %21 = vector.load %arg8[%c0_15, %c0_16] : memref<2x16xf32, #tpu.memory_space<vmem>>, vector<2x16xf32>
    tpu.vector_store %arg8[%c0_15, %c0_16], %20 {strides = array<i32>} : memref<2x16xf32, #tpu.memory_space<vmem>>, vector<2x16xf32>,
    return
  }
  func.func @transform_0(%arg0: i32) -> (i32, i32) {
    %c0_i32 = arith.constant 0 : i32
    %c0_i32_0 = arith.constant 0 : i32
    return %arg0, %c0_i32 : i32, i32
  }
  func.func @transform_1(%arg0: i32) -> (i32, i32) {
    %c0_i32 = arith.constant 0 : i32
    %c0_i32_0 = arith.constant 0 : i32
    %c0_i32_1 = arith.constant 0 : i32
    return %c0_i32, %c0_i32_0 : i32, i32
  }
  func.func @transform_2(%arg0: i32) -> (i32, i32) {
    %c0_i32 = arith.constant 0 : i32
    %c0_i32_0 = arith.constant 0 : i32
    %c0_i32_1 = arith.constant 0 : i32
    return %c0_i32, %c0_i32_0 : i32, i32
  }
  func.func @transform_3(%arg0: i32) -> (i32, i32) {
    %c0_i32 = arith.constant 0 : i32
    %c0_i32_0 = arith.constant 0 : i32
    %c0_i32_1 = arith.constant 0 : i32
    return %c0_i32, %c0_i32_0 : i32, i32
  }
  func.func @transform_4(%arg0: i32) -> (i32, i32) {
    %c0_i32 = arith.constant 0 : i32
    %c0_i32_0 = arith.constant 0 : i32
    %c0_i32_1 = arith.constant 0 : i32
    return %c0_i32, %c0_i32_0 : i32, i32
  }
  func.func @transform_5(%arg0: i32) -> (i32, i32) {
    %c0_i32 = arith.constant 0 : i32
    %c0_i32_0 = arith.constant 0 : i32
    %c0_i32_1 = arith.constant 0 : i32
    return %c0_i32, %c0_i32_0 : i32, i32
  }
  func.func @transform_6(%arg0: i32) -> (i32, i32) {
    %c0_i32 = arith.constant 0 : i32
    %c0_i32_0 = arith.constant 0 : i32
    %c0_i32_1 = arith.constant 0 : i32
    return %c0_i32, %c0_i32_0 : i32, i32
  }
  func.func @transform_7(%arg0: i32) -> (i32, i32) {
    %c0_i32 = arith.constant 0 : i32
    %c0_i32_0 = arith.constant 0 : i32
    return %arg0, %c0_i32 : i32, i32
  }
}

</mosaic_0001>

<bundles_post_ra>
// kernel: _decoder_forward_jit.1
= control target key start
LH: loop header
LB: loop body
LE: loop exit
PB: predicated region body
PF: predicated region fallthrough
CT: control target
= control target key end

     0   :  { %v477_v1 = vmov 0   ;;  %vm89_vm0 = vcmask 523264   ;;  %v39_v27 = vlaneseq  ;;  %v478_v44 = vmov 0.0   ;;  %s610_s1 = inlined_call_operand.vmem [shape: bf16[64,256], index: 1, kind: input, shape index: {}]   ;;  %s611_s3 = inlined_call_operand.vmem [shape: bf16[256,16], index: 3, kind: input, shape index: {}]   ;;  %s612_s0 = inlined_call_operand.vmem [shape: f32[2,64], index: 0, kind: input, shape index: {}]   ;;  %s613_s2 = inlined_call_operand.vmem [shape: f32[1,256], index: 2, kind: input, shape index: {}]   ;;  %s614_s5 = inlined_call_operand.vmem [shape: bf16[16,16], index: 5, kind: input, shape index: {}]   ;;  %s615_s4 = inlined_call_operand.vmem [shape: f32[1,16], index: 4, kind: input, shape index: {}]   ;;  %s616_s6 = inlined_call_operand.vmem [shape: f32[1,16], index: 6, kind: input, shape index: {}]   ;;  %s617_s7 = inlined_call_operand.vmem [shape: f32[2,16], index: 7, kind: output, shape index: {}]  }
   0x1   :  { %v442_v0 = vld [vmem:[%s610_s1 + $0x34] ss:$8 sps:$4 sm:$0xff]   ;;  %125 = vmatprep.mubr.bf16.mxu0 %v477_v1  ;;  %v444_v2 = vld [vmem:[%s610_s1 + $0x30] ss:$8 sps:$4 sm:$0xff]   ;;  %v445_v3 = vld [vmem:[%s610_s1 + $0x24] ss:$8 sps:$4 sm:$0xff]  }
   0x2   :  { %101 = vmatprep.subr.bf16.mxu0 %v442_v0  ;;  %v447_v4 = vld [vmem:[%s610_s1 + $0x20] ss:$8 sps:$4 sm:$0xff]   ;;  %v448_v5 = vld [vmem:[%s610_s1 + $0x14] ss:$8 sps:$4 sm:$0xff]   ;;  %v450_v6 = vld [vmem:[%s610_s1 + $0x10] ss:$8 sps:$4 sm:$0xff]  }
   0x3   :  { %102 = vmatpush1.bf16.msra.mxu0 %v444_v2  ;;  %v451_v7 = vld [vmem:[%s610_s1 + $0x4] ss:$8 sps:$4 sm:$0xff]   ;;  %v454_v8 = vld [vmem:[%s611_s3 + $0x78] sm:$0xff]   ;;  %v456_v10 = vld [vmem:[%s611_s3 + $0x70] sm:$0xff]   ;;  %v40_v28 = vshrl.u32 %v39_v27, 7  ;;  %vm479_vm1 = vmmov 0  }
   0x4   :  { %103 = vmatprep.subr.bf16.mxu0 %v445_v3  ;;  %v455_v9 = vld [vmem:[%s611_s3 + $0x38] sm:$0xff]   ;;  %409 = vmatprep.subr.bf16.mxu1 %v454_v8  ;;  %v453_v11 = vld [vmem:[%s610_s1] ss:$8 sps:$4 sm:$0xff]   ;;  %v457_v12 = vld [vmem:[%s611_s3 + $0x30] sm:$0xff]   ;;  %vm330_vm2 = vcmask 130048   ;;  %vm374_vm3 = vcmask 123904  }
   0x5   :  { %410 = vmatpush3.bf16.msra.mxu1 %v455_v9  ;;  %v27_v13 = vld [vmem:[%s612_s0] sm:$0x3]  ;;  %v458_v14 = vld [vmem:[%s611_s3 + $0x68] sm:$0xff]   ;;  %v462_v19 = vld [vmem:[%s611_s3 + $0x58] sm:$0xff]   ;;  %v41_v29 = vsub.s32 0, %v40_v28  ;;  %v45_v31 = vsub.s32 1, %v40_v28 }
   0x6   :  { %411 = vmatprep.subr.bf16.mxu1 %v456_v10  ;;  %v28_v15 = vpack.c.bf16 %v27_v13, %v27_v13  ;;  %v459_v16 = vld [vmem:[%s611_s3 + $0x28] sm:$0xff]   ;;  %v460_v17 = vld [vmem:[%s611_s3 + $0x60] sm:$0xff]   ;;  %v463_v20 = vld [vmem:[%s611_s3 + $0x18] sm:$0xff]  }
   0x7   :  { %104 = vmatpush1.bf16.msra.mxu0 %v447_v4  ;;  %v461_v18 = vld [vmem:[%s611_s3 + $0x20] sm:$0xff]   ;;  %v464_v21 = vld [vmem:[%s611_s3 + $0x50] sm:$0xff]   ;;  %v466_v23 = vld [vmem:[%s611_s3 + $0x48] sm:$0xff]  }
   0x8   :  { %105 = vmatprep.subr.bf16.mxu0 %v448_v5  ;;  %v465_v22 = vld [vmem:[%s611_s3 + $0x10] sm:$0xff]   ;;  %v467_v24 = vld [vmem:[%s611_s3 + $0x8] sm:$0xff]   ;;  %v468_v25 = vld [vmem:[%s611_s3 + $0x40] sm:$0xff]  }
   0x9   :  { %412 = vmatpush3.bf16.msra.mxu1 %v457_v12  ;;  %v469_v26 = vld [vmem:[%s611_s3] sm:$0xff]  }
   0xa   :  { %413 = vmatprep.subr.bf16.mxu1 %v458_v14  ;;  %v37_v30 = vld [vmem:[%s613_s2] sm:$0x3] }
   0xb   :  { %106 = vmatpush1.bf16.msra.mxu0 %v450_v6  ;;  %v42_v32 = vrot.slane %v37_v30, %v41_v29  ;;  %v46_v33 = vrot.slane %v37_v30, %v45_v31  ;;  %v470_v45 = vld [vmem:[%s614_s5] sm:$0xff]  }
   0xc   :  { %107 = vmatprep.subr.bf16.mxu0 %v451_v7  ;;  %v389_v47 = vld [vmem:[%s615_s4] ss:$0 sm:$0xff] }
   0xd   :  { %414 = vmatpush3.bf16.msra.mxu1 %v459_v16  ;;  %v406_v55 = vld [vmem:[%s616_s6] ss:$0 sm:$0xff] }
   0xe   :  { %415 = vmatprep.subr.bf16.mxu1 %v460_v17 }
   0xf   :  { %108 = vmatpush1.bf16.msra.mxu0 %v453_v11 }
  0x10   :  { %433 = vmatprep.subr.bf16.mxu0 %v478_v44 }
  0x11   :  { %416 = vmatpush3.bf16.msra.mxu1 %v461_v18 }
  0x12   :  { %388 = vmatmul.mubr.msk.bf16.vlgmr.msra.gmra.mxu0 %vm89_vm0, %v28_v15  ;;  %417 = vmatprep.subr.bf16.mxu1 %v462_v19 }
  0x13   :  { %435 = vmatprep.mubr.msk.bf16.mxu0 %vm479_vm1, %v478_v44  ;;  %434 = vmatpush3.bf16.msra.mxu0 %v470_v45 }
  0x15   :  { %418 = vmatpush3.bf16.msra.mxu1 %v463_v20 }
  0x16   :  { %419 = vmatprep.subr.bf16.mxu1 %v464_v21 }
  0x19   :  { %420 = vmatpush3.bf16.msra.mxu1 %v465_v22 }
  0x1a   :  { %421 = vmatprep.subr.bf16.mxu1 %v466_v23 }
  0x1d   :  { %422 = vmatpush3.bf16.msra.mxu1 %v467_v24 }
  0x1e   :  { %423 = vmatprep.subr.bf16.mxu1 %v468_v25 }
  0x21   :  { %424 = vmatpush3.bf16.msra.mxu1 %v469_v26 }
  0xd2   :  { %v127_v34 = vpop.f32.mrf.mxu0 }
  0xd3   :  { %v128_v35 = vadd.f32 %v127_v34, %v42_v32 }
  0xd4   :  { %v129_v36 = vpop.f32.mrf.mxu0 }
  0xd5   :  { %v130_v37 = vadd.f32 %v129_v36, %v46_v33  ;;  %v134_v38 = vpack.c.bf16 %v128_v35, %v128_v35 }
  0xd6   :  { %v131_v39 = vpop.f32.mrf.mxu0 }
  0xd7   :  { %v135_v40 = vpack.c.bf16 %v130_v37, %v130_v37 }
  0xd8   :  { %v132_v41 = vpop.f32.mrf.mxu0 }
  0xd9   :  { %471 = vtanh.bf16 %v135_v40 }
  0xda   :  { %473 = vtanh.bf16 %v134_v38 }
  0xe7   :  { %v472_v42 = vpop.eup %471 }
  0xe8   :  { %v474_v43 = vpop.eup %473  ;;  %305 = vmatprep.mubr.bf16.mxu1 %v472_v42 }
  0xe9   :  { %306 = vmatmul.mubr.bf16.vlgmr.msra.gmra.mxu1 %v474_v43 }
 0x1a9   :  { %v425_v46 = vpop.f32.mrf.mxu1 }
 0x1ab   :  { %v426_v48 = vpop.f32.mrf.mxu1 }
 0x1ac   :  { %v427_v49 = vadd.f32 %v426_v48, %v425_v46 }
 0x1ad   :  { %v428_v50 = vpop.f32.mrf.mxu1 }
 0x1ae   :  { %v308_v51 = vadd.f32 %v427_v49, %v389_v47 }
 0x1af   :  { %v429_v52 = vpop.f32.mrf.mxu1 }
 0x1b0   :  { %v313_v53 = vpack.c.bf16 %v308_v51, %v308_v51 }
 0x1b2   :  { %475 = vtanh.bf16 %v313_v53 }
 0x1c0   :  { %v476_v54 = vpop.eup %475 }
 0x1c1   :  { %436 = vmatmul.mubr.msk.bf16.vlgmr.msra.gmra.mxu0 %vm330_vm2, %v476_v54 }
 0x281   :  { %v368_v56 = vpop.f32.mrf.mxu0 }
 0x282   :  { %v369_v57 = vadd.f32 %v406_v55, %v368_v56 }
 0x283   :  { %v437_v58 = vpop.f32.mrf.mxu0 }
 0x284   :  { %375 = vst.msk [vmem:[%s617_s7] sm:$0x3] %vm374_vm3, %v369_v57 }
 0x285   :  { %v371_v59 = vpop.f32.mrf.mxu0 }
 0x287   :  { %v438_v60 = vpop.f32.mrf.mxu0 }

</bundles_post_ra>
